<compile_context>
chip_gen: v6e
topology: v6e:2x2x1
jax: 0.10.0
libtpu: 0.0.40
codegen_flags: <defaults>
</compile_context>

<pallas_src>
import jax
import jax.numpy as jnp
from jax.experimental import pallas as pl
from jax.experimental.pallas import tpu as pltpu


def _round_up(x: int, m: int) -> int:
    return ((x + m - 1) // m) * m


def _mlp_kernel(xT_ref, w1_ref, b1_ref, w2_ref, b2_ref, o_ref):
    # xT_ref: (F, T)   features on sublanes, batch on lanes
    # w1_ref: (H, F)   fc1.weight (PyTorch layout), VMEM-resident
    # b1_ref: (H, 1)   fc1.bias as a column
    # w2_ref: (H, 1)   fc2.weight as a column
    # b2_ref: (1, 1)   fc2.bias scalar in SMEM
    # o_ref : (1, T)   lane-dense output tile
    xT = xT_ref[...]
    w1 = w1_ref[...]
    n_feat = w1.shape[1]

    # fc1 as unrolled broadcast-FMAs on the VPU: K = n_feat (3) is far too
    # small for the MXU (it would pad K to 128/256 -> pure fixed overhead).
    acc = w1[:, 0:1] * xT[0:1, :]                       # (H, 1) * (1, T) -> (H, T)
    for k in range(1, n_feat):
        acc = acc + w1[:, k : k + 1] * xT[k : k + 1, :]
    h = jnp.maximum(acc + b1_ref[...], 0.0)             # + bias, ReLU  -> (H, T)

    # fc2 (output width 1): elementwise multiply + cross-sublane reduce (XLU),
    # then add the scalar bias from SMEM.
    y = jnp.sum(h * w2_ref[...], axis=0, keepdims=True) + b2_ref[0, 0]   # (1, T)

    # Sigmoid: exp on the EUP; approx reciprocal also lands on the EUP slot.
    o_ref[...] = pl.reciprocal(1.0 + jnp.exp(-y), approx=True)


def fire_occurrence_forward(x, w1, b1, w2, b2, *, tile_n: int = 8192):
    """Forward pass of FireOccurrenceModel.

    Args (PyTorch layouts):
      x : (N, F) float32 features
      w1: (H, F) fc1.weight,  b1: (H,) fc1.bias
      w2: (1, H) fc2.weight,  b2: (1,) fc2.bias
    Returns:
      (N, 1) float32 probabilities.
    """
    n, in_features = x.shape
    hidden = w1.shape[0]
    assert w1.shape == (hidden, in_features)

    # Kernel-friendly layouts: batch on the lane axis (lane-dense DMA/stores).
    xT = jnp.asarray(x, jnp.float32).T                           # (F, N)
    w1c = jnp.asarray(w1, jnp.float32)                           # (H, F)
    b1c = jnp.reshape(jnp.asarray(b1, jnp.float32), (hidden, 1)) # (H, 1)
    w2c = jnp.reshape(jnp.asarray(w2, jnp.float32), (hidden, 1)) # (H, 1)
    b2s = jnp.reshape(jnp.asarray(b2, jnp.float32), (1, 1))      # scalar -> SMEM

    # Tile the batch along the lane axis; pad N to a multiple of the tile.
    tile = min(tile_n, _round_up(n, 128))
    n_pad = _round_up(n, tile)
    if n_pad != n:
        xT = jnp.pad(xT, ((0, 0), (0, n_pad - n)))

    grid = (n_pad // tile,)

    out = pl.pallas_call(
        _mlp_kernel,
        grid=grid,
        out_shape=jax.ShapeDtypeStruct((1, n_pad), jnp.float32),
        in_specs=[
            # Streamed, double-buffered x tile: (F, tile), batch on lanes.
            pl.BlockSpec((in_features, tile), lambda i: (0, i)),
            # Weights / biases: constant block index -> DMA'd once, VMEM-resident.
            pl.BlockSpec((hidden, in_features), lambda i: (0, 0)),
            pl.BlockSpec((hidden, 1), lambda i: (0, 0)),
            pl.BlockSpec((hidden, 1), lambda i: (0, 0)),
            # fc2 bias scalar in SMEM (avoids a padded (8,128) VMEM tile + DMA).
            pl.BlockSpec(memory_space=pltpu.MemorySpace.SMEM),
        ],
        out_specs=pl.BlockSpec((1, tile), lambda i: (0, i)),
        compiler_params=pltpu.CompilerParams(
            dimension_semantics=("parallel",),   # v7x: shard tiles over both TCs
        ),
    )(xT, w1c, b1c, w2c, b2s)

    # (1, n_pad) -> (N, 1): drop padding, restore the PyTorch output shape.
    return out[0, :n].reshape(n, 1)


if __name__ == "__main__":
    input_size = 3   # LONGITUDE, LATITUDE, DISCOVERY_DATE
    hidden = 64
    batch = 8

    key = jax.random.PRNGKey(0)
    kx, k1, k2, k3, k4 = jax.random.split(key, 5)

    # Synthetic stand-in for the CSV-derived features.
    x = jax.random.normal(kx, (batch, input_size), jnp.float32)

    # PyTorch nn.Linear default init: U[-1/sqrt(fan_in), 1/sqrt(fan_in)],
    # stored in PyTorch layouts (weight: (out, in)).
    bound1 = 1.0 / (input_size ** 0.5)
    bound2 = 1.0 / (hidden ** 0.5)
    w1 = jax.random.uniform(k1, (hidden, input_size), jnp.float32, -bound1, bound1)
    b1 = jax.random.uniform(k2, (hidden,), jnp.float32, -bound1, bound1)
    w2 = jax.random.uniform(k3, (1, hidden), jnp.float32, -bound2, bound2)
    b2 = jax.random.uniform(k4, (1,), jnp.float32, -bound2, bound2)

    out = fire_occurrence_forward(x, w1, b1, w2, b2)
    out = jax.block_until_ready(out)

    # Plain-JAX reference of the PyTorch forward:
    #   sigmoid(relu(x @ W1.T + b1) @ W2.T + b2)
    h_ref = jnp.maximum(x @ w1.T + b1, 0.0)
    ref = 1.0 / (1.0 + jnp.exp(-(h_ref @ w2.T + b2)))

    assert out.shape == (batch, 1), out.shape
    # Slightly looser tolerance: the kernel uses the EUP approx reciprocal
    # for the sigmoid denominator (unit-level error << 1e-3).
    assert jnp.allclose(out, ref, atol=2e-3, rtol=2e-3), float(jnp.max(jnp.abs(out - ref)))

    print("KERNEL_OK")
</pallas_src>

<mosaic_0001>
module attributes {stable_mosaic.version = 11 : i64} {
  func.func @_mlp_kernel(%arg0: i32, %arg1: memref<3x128xf32, #tpu.memory_space<vmem>>, %arg2: memref<64x3xf32, #tpu.memory_space<vmem>>, %arg3: memref<64x1xf32, #tpu.memory_space<vmem>>, %arg4: memref<64x1xf32, #tpu.memory_space<vmem>>, %arg5: memref<1x1xf32, #tpu.memory_space<smem>>, %arg6: memref<1x128xf32, #tpu.memory_space<vmem>>) attributes {dimension_semantics = [#tpu.dimension_semantics<parallel>], iteration_bounds = array<i64: 1>, scalar_prefetch = 0 : i64, scratch_operands = 0 : i64, tpu.core_type = #tpu.core_type<tc>, window_params = [{transform_indices = @transform_0, window_bounds = array<i64: 3, 128>}, {pipeline_mode = #tpu.pipeline_mode<synchronous>, transform_indices = @transform_1, window_bounds = array<i64: 64, 3>}, {pipeline_mode = #tpu.pipeline_mode<synchronous>, transform_indices = @transform_2, window_bounds = array<i64: 64, 1>}, {pipeline_mode = #tpu.pipeline_mode<synchronous>, transform_indices = @transform_3, window_bounds = array<i64: 64, 1>}, {transform_indices = @transform_4, window_bounds = array<i64: 1, 1>}, {transform_indices = @transform_5, window_bounds = array<i64: 1, 128>}]} {
    %c0 = arith.constant 0 : index
    %c0_0 = arith.constant 0 : index
    %0 = vector.load %arg1[%c0, %c0_0] : memref<3x128xf32, #tpu.memory_space<vmem>>, vector<3x128xf32>
    %c0_1 = arith.constant 0 : index
    %c0_2 = arith.constant 0 : index
    %1 = vector.load %arg2[%c0_1, %c0_2] : memref<64x3xf32, #tpu.memory_space<vmem>>, vector<64x3xf32>
    %2 = vector.extract_strided_slice %1 {offsets = [0, 0], sizes = [64, 1], strides = [1, 1]} : vector<64x3xf32> to vector<64x1xf32>
    %3 = vector.extract_strided_slice %0 {offsets = [0, 0], sizes = [1, 128], strides = [1, 1]} : vector<3x128xf32> to vector<1x128xf32>
    %4 = vector.broadcast %2 : vector<64x1xf32> to vector<64x128xf32>
    %5 = vector.broadcast %3 : vector<1x128xf32> to vector<64x128xf32>
    %6 = arith.mulf %4, %5 : vector<64x128xf32>
    %7 = vector.extract_strided_slice %1 {offsets = [0, 1], sizes = [64, 1], strides = [1, 1]} : vector<64x3xf32> to vector<64x1xf32>
    %8 = vector.extract_strided_slice %0 {offsets = [1, 0], sizes = [1, 128], strides = [1, 1]} : vector<3x128xf32> to vector<1x128xf32>
    %9 = vector.broadcast %7 : vector<64x1xf32> to vector<64x128xf32>
    %10 = vector.broadcast %8 : vector<1x128xf32> to vector<64x128xf32>
    %11 = arith.mulf %9, %10 : vector<64x128xf32>
    %12 = arith.addf %6, %11 : vector<64x128xf32>
    %13 = vector.extract_strided_slice %1 {offsets = [0, 2], sizes = [64, 1], strides = [1, 1]} : vector<64x3xf32> to vector<64x1xf32>
    %14 = vector.extract_strided_slice %0 {offsets = [2, 0], sizes = [1, 128], strides = [1, 1]} : vector<3x128xf32> to vector<1x128xf32>
    %15 = vector.broadcast %13 : vector<64x1xf32> to vector<64x128xf32>
    %16 = vector.broadcast %14 : vector<1x128xf32> to vector<64x128xf32>
    %17 = arith.mulf %15, %16 : vector<64x128xf32>
    %18 = arith.addf %12, %17 : vector<64x128xf32>
    %c0_3 = arith.constant 0 : index
    %c0_4 = arith.constant 0 : index
    %19 = vector.load %arg3[%c0_3, %c0_4] : memref<64x1xf32, #tpu.memory_space<vmem>>, vector<64x1xf32>
    %20 = vector.broadcast %19 : vector<64x1xf32> to vector<64x128xf32>
    %21 = arith.addf %18, %20 : vector<64x128xf32>
    %cst = arith.constant 0.000000e+00 : f32
    %22 = vector.broadcast %cst : f32 to vector<64x128xf32>
    %23 = arith.maximumf %21, %22 : vector<64x128xf32>
    %c0_5 = arith.constant 0 : index
    %c0_6 = arith.constant 0 : index
    %24 = vector.load %arg4[%c0_5, %c0_6] : memref<64x1xf32, #tpu.memory_space<vmem>>, vector<64x1xf32>
    %25 = vector.broadcast %24 : vector<64x1xf32> to vector<64x128xf32>
    %26 = arith.mulf %23, %25 : vector<64x128xf32>
    %cst_7 = arith.constant dense<0.000000e+00> : vector<128xf32>
    %27 = vector.multi_reduction <add>, %26, %cst_7 [0] : vector<64x128xf32> to vector<128xf32>
    %28 = vector.shape_cast %27 : vector<128xf32> to vector<1x128xf32>
    %c0_8 = arith.constant 0 : index
    %c0_9 = arith.constant 0 : index
    %29 = memref.load %arg5[%c0_8, %c0_9] : memref<1x1xf32, #tpu.memory_space<smem>>
    %30 = vector.broadcast %29 : f32 to vector<1x128xf32>
    %31 = arith.addf %28, %30 : vector<1x128xf32>
    %cst_10 = arith.constant 0.000000e+00 : f32
    %32 = vector.broadcast %cst_10 : f32 to vector<1x128xf32>
    %33 = arith.subf %32, %31 : vector<1x128xf32>
    %34 = math.exp %33 : vector<1x128xf32>
    %cst_11 = arith.constant 1.000000e+00 : f32
    %35 = vector.broadcast %cst_11 : f32 to vector<1x128xf32>
    %36 = arith.addf %35, %34 : vector<1x128xf32>
    %37 = tpu.reciprocal %36 {approx = true} : vector<1x128xf32> -> vector<1x128xf32>
    %c0_12 = arith.constant 0 : index
    %c0_13 = arith.constant 0 : index
    %38 = vector.load %arg6[%c0_12, %c0_13] : memref<1x128xf32, #tpu.memory_space<vmem>>, vector<1x128xf32>
    tpu.vector_store %arg6[%c0_12, %c0_13], %37 {strides = array<i32>} : memref<1x128xf32, #tpu.memory_space<vmem>>, vector<1x128xf32>,
    return
  }
  func.func @transform_0(%arg0: i32) -> (i32, i32) {
    %c0_i32 = arith.constant 0 : i32
    %c0_i32_0 = arith.constant 0 : i32
    return %c0_i32, %arg0 : i32, i32
  }
  func.func @transform_1(%arg0: i32) -> (i32, i32) {
    %c0_i32 = arith.constant 0 : i32
    %c0_i32_0 = arith.constant 0 : i32
    %c0_i32_1 = arith.constant 0 : i32
    return %c0_i32, %c0_i32_0 : i32, i32
  }
  func.func @transform_2(%arg0: i32) -> (i32, i32) {
    %c0_i32 = arith.constant 0 : i32
    %c0_i32_0 = arith.constant 0 : i32
    %c0_i32_1 = arith.constant 0 : i32
    return %c0_i32, %c0_i32_0 : i32, i32
  }
  func.func @transform_3(%arg0: i32) -> (i32, i32) {
    %c0_i32 = arith.constant 0 : i32
    %c0_i32_0 = arith.constant 0 : i32
    %c0_i32_1 = arith.constant 0 : i32
    return %c0_i32, %c0_i32_0 : i32, i32
  }
  func.func @transform_4(%arg0: i32) -> (i32, i32) {
    %c0_i32 = arith.constant 0 : i32
    %c0_i32_0 = arith.constant 0 : i32
    %c0_i32_1 = arith.constant 0 : i32
    return %c0_i32, %c0_i32_0 : i32, i32
  }
  func.func @transform_5(%arg0: i32) -> (i32, i32) {
    %c0_i32 = arith.constant 0 : i32
    %c0_i32_0 = arith.constant 0 : i32
    return %c0_i32, %arg0 : i32, i32
  }
}

</mosaic_0001>

<bundles_post_ra>
// kernel: tpu_custom_call.1
= control target key start
LH: loop header
LB: loop body
LE: loop exit
PB: predicated region body
PF: predicated region fallthrough
CT: control target
= control target key end

     0   :  { %v390_v2 = vmov 2   ;;  %v391_v3 = vmov 0   ;;  %s557_s0 = inlined_call_operand.vmem [shape: f32[3,128], index: 0, kind: input, shape index: {}]   ;;  %s558_s1 = inlined_call_operand.vmem [shape: f32[64,3], index: 1, kind: input, shape index: {}]   ;;  %s559_s2 = inlined_call_operand.vmem [shape: f32[64,1], index: 2, kind: input, shape index: {}]   ;;  %s560_s3 = inlined_call_operand.vmem [shape: f32[64,1], index: 3, kind: input, shape index: {}]   ;;  %s561_s4 = inlined_call_operand.<no memory space> [shape: f32[1,1], index: 4, kind: input, shape index: {}]   ;;  %s562_s5 = inlined_call_operand.hbm [shape: f32[1,128], index: 5, kind: output, shape index: {}]  }
   0x1   :  { %v25_v0 = vld [vmem:[%s558_s1 + $0x10] sm:$0xff]  ;;  %v23_v1 = vld [vmem:[%s558_s1] sm:$0xff]  ;;  %349 = vset.pattern.permute.xlu0 %v390_v2  ;;  %347 = vset.pattern.permute.xlu1 %v391_v3  ;;  %v26_v4 = vld [vmem:[%s558_s1 + $0x18] sm:$0xff] }
   0x2   :  { %43 = vperm.xlu1 %347, %v25_v0   ;;  %136 = vperm.xlu0 %349, %v23_v1   ;;  %v28_v5 = vld [vmem:[%s558_s1 + $0x28] sm:$0xff] }
   0x6   :  { %48 = vperm.xlu1 %347, %v26_v4   ;;  %144 = vperm.xlu0 %349, %v25_v0  }
   0x7   :  { %11 = vsyncpa [#allocation4], 0  ;;  %v24_v6 = vld [vmem:[%s558_s1 + $0x8] sm:$0xff]  ;;  %v392_v7 = vmov 1   ;;  %v29_v8 = vld [vmem:[%s558_s1 + $0x30] sm:$0xff]  ;;  %v71_v43 = vlaneseq  ;;  %s393_s15 = smov [#allocation3]  }
   0x8   :  { %v30_v9 = vld [vmem:[%s558_s1 + $0x38] sm:$0xff]  ;;  %v27_v10 = vld [vmem:[%s558_s1 + $0x20] sm:$0xff]  ;;  %v188_v12 = vld [vmem:[%s559_s2 + $0x8] sm:$0xff]  ;;  %s335_s16 = sshll.u32 %s393_s15, 4  ;;  %s336_s16 = int_to_ptr.vmem [resolvable:$true] %s335_s16 }
   0x9   :  { %v187_v11 = vld [vmem:[%s559_s2] sm:$0xff]  ;;  %v189_v13 = vld [vmem:[%s559_s2 + $0x10] sm:$0xff]  ;;  %v254_v16 = vld [vmem:[%s560_s3 + $0x18] sm:$0xff]  ;;  %v72_v45 = vshrl.u32 %v71_v43, 7  ;;  %s368_s17 = scalar_lea.vmem %s336_s16, 16  ;;  %s372_s18 = scalar_lea.vmem %s336_s16, 32 }
   0xa   :  { %58 = vperm.xlu1 %347, %v28_v5   ;;  %148 = vperm.xlu0 %349, %v26_v4   ;;  %v251_v14 = vld [vmem:[%s560_s3] sm:$0xff]  ;;  %v253_v15 = vld [vmem:[%s560_s3 + $0x10] sm:$0xff]  ;;  %v190_v18 = vld [vmem:[%s559_s2 + $0x18] sm:$0xff]  ;;  %p369_p0 = scmp.ne.s32.totalorder %s336_s16, %s368_s17  ;;  %p373_p1 = scmp.lt.s32.totalorder %s336_s16, %s336_s16 }
   0xb   :  { %v255_v17 = vld [vmem:[%s560_s3 + $0x20] sm:$0xff]  ;;  %v256_v19 = vld [vmem:[%s560_s3 + $0x28] sm:$0xff]  ;;  %v258_v21 = vld [vmem:[%s560_s3 + $0x38] sm:$0xff]  ;;  %v73_v48 = vsub.s32 0, %v72_v45  ;;  %v117_v49 = vsub.s32 1, %v72_v45  ;;  %v169_v51 = vsub.s32 2, %v72_v45  ;;  %p374_p2 = scmp.lt.s32.totalorder %s372_s18, %s368_s17 }
   0xc   :  { %v252_v20 = vld [vmem:[%s560_s3 + $0x8] sm:$0xff]  ;;  %v191_v22 = vld [vmem:[%s559_s2 + $0x20] sm:$0xff]  ;;  %v193_v24 = vld [vmem:[%s559_s2 + $0x30] sm:$0xff] }
   0xd   :  { %v192_v23 = vld [vmem:[%s559_s2 + $0x28] sm:$0xff]  ;;  %v194_v25 = vld [vmem:[%s559_s2 + $0x38] sm:$0xff]  ;;  %v257_v26 = vld [vmem:[%s560_s3 + $0x30] sm:$0xff]  ;;  %p375_p3 = por %p374_p2, %p373_p1 }
   0xe   :  { %348 = vset.pattern.permute.xlu1 %v392_v7  ;;  %352 = vset.pattern.permute.xlu0 %v392_v7  ;;  %v22_v50 = vld [vmem:[%s557_s0] sm:$0x7] }
   0xf   :  { %88 = vperm.xlu1 %348, %v24_v6   ;;  %84 = vperm.xlu0 %352, %v23_v1   ;;  %v518_v53 = vrot.slane %v22_v50, %v73_v48  ;;  %v520_v54 = vrot.slane %v22_v50, %v117_v49  ;;  %v524_v58 = vrot.slane %v22_v50, %v169_v51  ;;  %p376_p4 = pnand %p375_p3, %p369_p0 }
  0x13   :  { %92 = vperm.xlu1 %348, %v25_v0   ;;  %108 = vperm.xlu0 %352, %v29_v8  }
  0x17   :  { %350 = vset.pattern.permute.xlu1 %v390_v2  ;;  %112 = vperm.xlu0 %352, %v30_v9  }
  0x18   :  { %140 = vperm.xlu1 %350, %v24_v6  }
  0x1b   :  { %359 = vset.pattern.permute.xlu0 %v391_v3 }
  0x1c   :  { %351 = vset.pattern.permute.xlu1 %v392_v7  ;;  %33 = vperm.xlu0 %359, %v23_v1  }
  0x1d   :  { %96 = vperm.xlu1 %351, %v26_v4  }
  0x20   :  { %38 = vperm.xlu0 %359, %v24_v6  }
  0x21   :  { %100 = vperm.xlu1 %351, %v27_v10  }
  0x24   :  { %53 = vperm.xlu0 %359, %v27_v10  }
  0x25   :  { %353 = vset.pattern.permute.xlu1 %v391_v3 }
  0x26   :  { %197 = vperm.xlu1 %353, %v187_v11  }
  0x28   :  { %202 = vperm.xlu0 %359, %v188_v12  }
  0x2a   :  { %354 = vset.pattern.permute.xlu1 %v392_v7 }
  0x2b   :  { %104 = vperm.xlu1 %354, %v28_v5  }
  0x2c   :  { %207 = vperm.xlu0 %359, %v189_v13  }
  0x2f   :  { %355 = vset.pattern.permute.xlu1 %v390_v2 }
  0x30   :  { %152 = vperm.xlu1 %355, %v27_v10   ;;  %261 = vperm.xlu0 %359, %v251_v14  }
  0x34   :  { %356 = vset.pattern.permute.xlu1 %v391_v3  ;;  %271 = vperm.xlu0 %359, %v253_v15  }
  0x35   :  { %63 = vperm.xlu1 %356, %v29_v8  }
  0x38   :  { %276 = vperm.xlu0 %359, %v254_v16  }
  0x39   :  { %357 = vset.pattern.permute.xlu1 %v390_v2 }
  0x3a   :  { %156 = vperm.xlu1 %357, %v28_v5  }
  0x3c   :  { %281 = vperm.xlu0 %359, %v255_v17  }
  0x3e   :  { %358 = vset.pattern.permute.xlu1 %v391_v3 }
  0x3f   :  { %212 = vperm.xlu1 %358, %v190_v18  }
  0x40   :  { %286 = vperm.xlu0 %359, %v256_v19  }
  0x43   :  { %266 = vperm.xlu1 %358, %v252_v20  }
  0x44   :  { %296 = vperm.xlu0 %359, %v258_v21  }
  0x47   :  { %68 = vperm.xlu1 %358, %v30_v9  }
  0x4b   :  { %360 = vset.pattern.permute.xlu1 %v390_v2 }
  0x4c   :  { %160 = vperm.xlu1 %360, %v29_v8  }
  0x50   :  { %361 = vset.pattern.permute.xlu1 %v391_v3 }
  0x51   :  { %217 = vperm.xlu1 %361, %v191_v22  }
  0x55   :  { %362 = vset.pattern.permute.xlu1 %v390_v2 }
  0x56   :  { %164 = vperm.xlu1 %362, %v30_v9  }
  0x5a   :  { %363 = vset.pattern.permute.xlu1 %v391_v3 }
  0x5b   :  { %222 = vperm.xlu1 %363, %v192_v23  }
  0x5f   :  { %227 = vperm.xlu1 %363, %v193_v24  }
  0x63   :  { %232 = vperm.xlu1 %363, %v194_v25  }
  0x67   :  { %291 = vperm.xlu1 %363, %v257_v26  }
  0x7d   :  { %v44_v27 = vpop.permute.xlu1 %43  ;;  %v137_v28 = vpop.permute.xlu0 %136 }
  0x7e   :  { %v171_v60 = vmul.f32 %v524_v58, %v137_v28  ;;  %v77_v3 = vmul.f32 %v518_v53, %v44_v27 }
  0x81   :  { %v49_v29 = vpop.permute.xlu1 %48  ;;  %v145_v30 = vpop.permute.xlu0 %144 }
  0x82   :  { %v78_v4 = vmul.f32 %v518_v53, %v49_v29  ;;  %v173_v6 = vmul.f32 %v524_v58, %v145_v30 }
  0x85   :  { %v509_v31 = vpop.permute.xlu1 %58  ;;  %v149_v32 = vpop.permute.xlu0 %148 }
  0x86   :  { %v174_v7 = vmul.f32 %v524_v58, %v149_v32 }
  0x8a   :  { %v89_v33 = vpop.permute.xlu1 %88  ;;  %v85_v34 = vpop.permute.xlu0 %84 }
  0x8b   :  { %v119_v56 = vmul.f32 %v520_v54, %v85_v34  ;;  %v120_v63 = vmul.f32 %v520_v54, %v89_v33 }
  0x8e   :  { %v93_v35 = vpop.permute.xlu1 %92  ;;  %v511_v36 = vpop.permute.xlu0 %108 }
  0x8f   :  { %v121_v0 = vmul.f32 %v520_v54, %v93_v35 }
  0x91   :  { %v129_v8 = vadd.f32 %v121_v0, %v77_v3 }
  0x92   :  { %v513_v37 = vpop.permute.xlu0 %112 }
  0x93   :  { %v141_v38 = vpop.permute.xlu1 %140  ;;  %v181_v17 = vadd.f32 %v173_v6, %v129_v8 }
  0x94   :  { %v172_v9 = vmul.f32 %v524_v58, %v141_v38 }
  0x97   :  { %v34_v39 = vpop.permute.xlu0 %33 }
  0x98   :  { %v97_v40 = vpop.permute.xlu1 %96  ;;  %v75_v57 = vmul.f32 %v518_v53, %v34_v39 }
  0x99   :  { %v122_v2 = vmul.f32 %v520_v54, %v97_v40 }
  0x9a   :  { %v127_v1 = vadd.f32 %v119_v56, %v75_v57 }
  0x9b   :  { %v39_v42 = vpop.permute.xlu0 %38  ;;  %v130_v10 = vadd.f32 %v122_v2, %v78_v4 }
  0x9c   :  { %v101_v41 = vpop.permute.xlu1 %100  ;;  %v76_v59 = vmul.f32 %v518_v53, %v39_v42  ;;  %v179_v11 = vadd.f32 %v171_v60, %v127_v1 }
  0x9d   :  { %v182_v18 = vadd.f32 %v174_v7, %v130_v10  ;;  %v123_v43 = vmul.f32 %v520_v54, %v101_v41  ;;  %v125_v41 = vmul.f32 %v520_v54, %v511_v36 }
  0x9e   :  { %v128_v5 = vadd.f32 %v120_v63, %v76_v59 }
  0x9f   :  { %v54_v46 = vpop.permute.xlu0 %53 }
  0xa0   :  { %v180_v14 = vadd.f32 %v172_v9, %v128_v5  ;;  %v79_v40 = vmul.f32 %v518_v53, %v54_v46 }
  0xa1   :  { %v198_v44 = vpop.permute.xlu1 %197 }
  0xa2   :  { %v235_v15 = vadd.f32 %v198_v44, %v179_v11  ;;  %v131_v45 = vadd.f32 %v123_v43, %v79_v40 }
  0xa3   :  { %v203_v52 = vpop.permute.xlu0 %202 }
  0xa4   :  { %v236_v16 = vadd.f32 %v203_v52, %v180_v14  ;;  %v243_v23 = vmax.f32 %v235_v15, 0.0  ;;  %v80_v52 = vmul.f32 %v518_v53, %v509_v31  ;;  %v126_v31 = vmul.f32 %v520_v54, %v513_v37 }
  0xa6   :  { %v105_v47 = vpop.permute.xlu1 %104  ;;  %v244_v24 = vmax.f32 %v236_v16, 0.0 }
  0xa7   :  { %v208_v61 = vpop.permute.xlu0 %207  ;;  %v124_v50 = vmul.f32 %v520_v54, %v105_v47 }
  0xa8   :  { %v237_v20 = vadd.f32 %v208_v61, %v181_v17 }
  0xa9   :  { %v132_v59 = vadd.f32 %v124_v50, %v80_v52 }
  0xaa   :  { %v245_v26 = vmax.f32 %v237_v20, 0.0 }
  0xab   :  { %v153_v55 = vpop.permute.xlu1 %152  ;;  %v262_v13 = vpop.permute.xlu0 %261 }
  0xac   :  { %v299_v27 = vmul.f32 %v262_v13, %v243_v23  ;;  %v175_v44 = vmul.f32 %v524_v58, %v153_v55 }
  0xae   :  { %v183_v49 = vadd.f32 %v175_v44, %v131_v45 }
  0xaf   :  { %v272_v22 = vpop.permute.xlu0 %271 }
  0xb0   :  { %v64_v62 = vpop.permute.xlu1 %63  ;;  %v301_v30 = vmul.f32 %v272_v22, %v245_v26 }
  0xb1   :  { %v81_v55 = vmul.f32 %v518_v53, %v64_v62 }
  0xb3   :  { %v277_v33 = vpop.permute.xlu0 %276  ;;  %v133_v3 = vadd.f32 %v125_v41, %v81_v55 }
  0xb5   :  { %v157_v12 = vpop.permute.xlu1 %156 }
  0xb6   :  { %v176_v56 = vmul.f32 %v524_v58, %v157_v12 }
  0xb7   :  { %v282_v46 = vpop.permute.xlu0 %281 }
  0xb8   :  { %v184_v61 = vadd.f32 %v176_v56, %v132_v59 }
  0xba   :  { %v213_v19 = vpop.permute.xlu1 %212 }
  0xbb   :  { %v238_v21 = vadd.f32 %v213_v19, %v182_v18  ;;  %v287_v6 = vpop.permute.xlu0 %286 }
  0xbd   :  { %v246_v28 = vmax.f32 %v238_v21, 0.0 }
  0xbe   :  { %v267_v25 = vpop.permute.xlu1 %266 }
  0xbf   :  { %v300_v29 = vmul.f32 %v267_v25, %v244_v24  ;;  %v302_v35 = vmul.f32 %v277_v33, %v246_v28  ;;  %v297_v37 = vpop.permute.xlu0 %296  ;;  %v321_v24 = vstv %s561_s4 }
  0xc1   :  { %v307_v32 = vadd.f32 %v300_v29, %v299_v27 }
  0xc2   :  { %v69_v34 = vpop.permute.xlu1 %68 }
  0xc3   :  { %v308_v38 = vadd.f32 %v307_v32, %v301_v30  ;;  %v82_v0 = vmul.f32 %v518_v53, %v69_v34 }
  0xc5   :  { %v309_v39 = vadd.f32 %v308_v38, %v302_v35  ;;  %v134_v36 = vadd.f32 %v126_v31, %v82_v0 }
  0xc7   :  { %v161_v42 = vpop.permute.xlu1 %160 }
  0xc8   :  { %v177_v47 = vmul.f32 %v524_v58, %v161_v42 }
  0xca   :  { %v185_v9 = vadd.f32 %v177_v47, %v133_v3 }
  0xcc   :  { %v218_v48 = vpop.permute.xlu1 %217 }
  0xcd   :  { %v239_v51 = vadd.f32 %v218_v48, %v183_v49 }
  0xcf   :  { %v247_v60 = vmax.f32 %v239_v51, 0.0 }
  0xd1   :  { %v165_v57 = vpop.permute.xlu1 %164  ;;  %v303_v1 = vmul.f32 %v282_v46, %v247_v60 }
  0xd2   :  { %v178_v4 = vmul.f32 %v524_v58, %v165_v57 }
  0xd3   :  { %v310_v8 = vadd.f32 %v309_v39, %v303_v1 }
  0xd4   :  { %v186_v11 = vadd.f32 %v178_v4, %v134_v36 }
  0xd6   :  { %v223_v63 = vpop.permute.xlu1 %222 }
  0xd7   :  { %v240_v2 = vadd.f32 %v223_v63, %v184_v61 }
  0xd9   :  { %v248_v5 = vmax.f32 %v240_v2, 0.0 }
  0xda   :  { %v228_v7 = vpop.permute.xlu1 %227 }
  0xdb   :  { %v304_v62 = vmul.f32 %v287_v6, %v248_v5  ;;  %v241_v10 = vadd.f32 %v228_v7, %v185_v9 }
  0xdd   :  { %v311_v53 = vadd.f32 %v310_v8, %v304_v62  ;;  %v249_v14 = vmax.f32 %v241_v10, 0.0 }
  0xde   :  { %v233_v12 = vpop.permute.xlu1 %232 }
  0xdf   :  { %v242_v13 = vadd.f32 %v233_v12, %v186_v11 }
  0xe1   :  { %v250_v15 = vmax.f32 %v242_v13, 0.0 }
  0xe2   :  { %v292_v16 = vpop.permute.xlu1 %291 }
  0xe3   :  { %v305_v17 = vmul.f32 %v292_v16, %v249_v14  ;;  %v306_v54 = vmul.f32 %v297_v37, %v250_v15 }
  0xe5   :  { %v312_v18 = vadd.f32 %v311_v53, %v305_v17 }
  0xe7   :  { %v313_v58 = vadd.f32 %v312_v18, %v306_v54 }
  0xe9   :  { %v314_v19 = vrot.slane %v313_v58, 4 }
  0xeb   :  { %v315_v20 = vadd.f32 %v314_v19, %v313_v58 }
  0xed   :  { %v316_v21 = vrot.slane %v315_v20, 2 }
  0xef   :  { %v317_v22 = vadd.f32 %v316_v21, %v315_v20 }
  0xf1   :  { %v318_v23 = vrot.slane %v317_v22, 1 }
  0xf3   :  { %v319_v25 = vadd.f32 %v318_v23, %v317_v22 }
  0xf5   :  { %v322_v26 = vadd.f32 %v321_v24, %v319_v25 }
  0xf7   :  { %v323_v27 = vsub.f32 0.0, %v322_v26 }
  0xf9   :  { %v324_v28 = vmul.f32 1.442695, %v323_v27 }
  0xfb   :  { %364 = vpow2.f32 %v324_v28 }
 0x108   :  { %v365_v29 = vpop.eup %364 }
 0x109   :  { %v326_v30 = vadd.f32 1.0, %v365_v29 }
 0x10b   :  { %366 = vrcp.f32 %v326_v30 }
 0x118   :  { %v367_v32 = vpop.eup %366 }
 0x119   :  { %328 = vst [vmem:[#allocation3] sm:$0x1] %v367_v32 }
 0x11a   :  { %379 = shalt.err (!%p376_p4)
}
 0x11b   :  { %338 = dma.vmem_to_hbm [thread:$0]  %s336_s16, 16, %s562_s5, [#allocation4]  }
 0x11c   :  { %388 = dma.done.wait [#allocation4], 16  }
 0x11d   :  { %389 = vsyncadd [#allocation4], 4294967280 }
 0x11e   :  { %342 = vsyncpa [#allocation4], 1 }

</bundles_post_ra>
